<compile_context>
chip_gen: v5e
topology: v5e:2x2
jax: 0.10.0
libtpu: 0.0.40
codegen_flags: <defaults>
</compile_context>

<pallas_src>
import functools

import jax
import jax.numpy as jnp
from jax import lax
from jax.experimental import pallas as pl
from jax.experimental.pallas import tpu as pltpu

# --- deterministic "module parameters" (mirrors _init_table) -----------------
ALL_ATOMS = ["C", "N", "O", "S", "H", "P", "CA", "CB"]
ALL_ATOM_POSNS = {a: i for i, a in enumerate(ALL_ATOMS)}
atom_radii = {"C": 1.70, "N": 1.55, "O": 1.52, "S": 1.80,
              "H": 1.20, "P": 1.80, "CA": 1.70, "CB": 1.70}
MAX_SEQ_LEN = 64
SCALE = 1.2          # self.scale
VDW_CUTOFF = 4.0     # self.vdw_cutoff


def _init_table():
    vdw_radii = jnp.zeros((len(ALL_ATOMS),), jnp.float32)
    for ai in ALL_ATOMS:
        vdw_radii = vdw_radii.at[ALL_ATOM_POSNS[ai]].set(atom_radii[ai])
    # repeat(vdw_radii, 'i -> n i', n=MAX_SEQ_LEN)
    return jnp.tile(vdw_radii[None, :], (MAX_SEQ_LEN, 1))


# Contract axis 0 of both operands (lhs-transposed matmul on the MXU).
_TN_DIMS = (((0,), (0,)), ((), ()))


# --- Pallas kernel ------------------------------------------------------------
def _vdw_kernel(ti_ref, tj_ref,                 # scalar prefetch (SMEM): tile row/col ids
                row_ref, col_ref,               # (16, tile) lane-dense packed operands
                out_ref,                        # (1, 2, tile) lane-dense partials
                *, tm, tn, cutoff_sq):
    t = pl.program_id(0)
    is_diag = ti_ref[t] == tj_ref[t]

    # Squared pairwise distances straight off the MXU (norms folded into the
    # augmented vectors); clamp the tiny negative cancellation residue.
    d2 = jnp.maximum(
        lax.dot_general(row_ref[0:8, :], col_ref[0:8, :], _TN_DIMS,
                        preferred_element_type=jnp.float32), 0.0)       # (tm, tn)
    # Masked radii outer-sum v_i*v_j*(r_i + r_j)/scale, also on the MXU.
    rsum = lax.dot_general(row_ref[8:16, :], col_ref[8:16, :], _TN_DIMS,
                           preferred_element_type=jnp.float32)          # (tm, tn)

    relu = jnp.maximum(rsum - jnp.sqrt(d2), 0.0)
    relu2 = relu * relu
    # Invalid / padded atoms live on sentinel coords > cutoff away from
    # everything, so the count predicate needs no validity mask.
    cnt = jnp.where(d2 < cutoff_sq, 1.0, 0.0)

    # Reduce sublanes only (VPU adds); the lane axis is reduced in the JAX
    # epilogue so the store is one lane-dense unmasked write per tile.
    s_rows = jnp.sum(relu2, axis=0, keepdims=True)                      # (1, tn)
    c_rows = jnp.sum(cnt, axis=0, keepdims=True)                        # (1, tn)
    out_ref[...] = jnp.concatenate([s_rows, c_rows], axis=0)[None]      # (1, 2, tn)

    # Only the nb diagonal tiles contain global self-pairs: strip exactly what
    # was just accumulated for them (both the relu^2 term and the count).
    @pl.when(is_diag)
    def _():
        eye = (lax.broadcasted_iota(jnp.int32, (tm, tn), 0) ==
               lax.broadcasted_iota(jnp.int32, (tm, tn), 1))
        ds = jnp.sum(jnp.where(eye, relu2, 0.0), axis=0, keepdims=True)
        dc = jnp.sum(jnp.where(eye, cnt, 0.0), axis=0, keepdims=True)
        out_ref[...] = jnp.concatenate([s_rows - ds, c_rows - dc], axis=0)[None]


def vdw_repulsive_loss(coords, mask, vdw_table, *, tile=None,
                       vmem_limit_bytes=32 * 1024 * 1024):
    """coords: (L, A, 3) f32, mask: (L, A) bool, vdw_table: (MAX_SEQ_LEN, A)."""
    L, A, _ = coords.shape
    n = L * A
    if tile is None:
        # Multiple of 128, capped at 512; sized so medium problems yield enough
        # upper-triangular tiles to split across v7x's two TensorCores
        # (harmless on single-core v5e/v6e).
        tile = int(min(512, max(128, 128 * ((n + 511) // 512))))
    assert tile % 128 == 0
    npad = pl.cdiv(n, tile) * tile
    pad = npad - n

    radii = vdw_table[:L].reshape(-1).astype(jnp.float32)               # (n,)
    v = mask.reshape(-1).astype(jnp.float32)                            # (n,)
    xyz = coords.reshape(n, 3).astype(jnp.float32)

    # Center valid coordinates: limits f32 cancellation in the Gram trick.
    nvalid = jnp.maximum(jnp.sum(v), 1.0)
    xyz = xyz - jnp.sum(xyz * v[:, None], axis=0) / nvalid

    v_p = jnp.pad(v, (0, pad))
    r_p = jnp.pad(radii, (0, pad))
    xyz_p = jnp.pad(xyz, ((0, pad), (0, 0)))

    # Sentinel grid for invalid / padded atoms: distinct points spaced 2*cutoff
    # apart, offset 2*cutoff beyond the valid bounding box, so every pair
    # involving them has d2 >> cutoff^2 (the count self-masks; the masked radii
    # outer-sum already zeroes their relu term).  A 3-D grid keeps coordinate
    # magnitudes ~O(npad^(1/3)) so f32 cancellation cannot fake d2 < cutoff^2.
    span = jnp.max(jnp.abs(xyz_p) * v_p[:, None])
    side = max(1, int(round(float(npad) ** (1.0 / 3.0))))
    idx = jnp.arange(npad, dtype=jnp.int32)
    step = 2.0 * float(VDW_CUTOFF)
    base = span + step
    sx = base + step * (idx % side).astype(jnp.float32)
    sy = base + step * ((idx // side) % side).astype(jnp.float32)
    sz = base + step * (idx // (side * side)).astype(jnp.float32)
    ok = v_p > 0.5
    x = jnp.where(ok, xyz_p[:, 0], sx)
    y = jnp.where(ok, xyz_p[:, 1], sy)
    z = jnp.where(ok, xyz_p[:, 2], sz)

    sq = x * x + y * y + z * z
    one = jnp.ones_like(x)
    zero = jnp.zeros_like(x)
    rm = r_p * v_p * (1.0 / SCALE)                                       # masked scaled radii

    # Lane-dense packed operands: atoms on lanes, the small K axis on sublanes.
    #   sublanes 0..7  : d2 Gram augmentation
    #   sublanes 8..15 : masked radii outer-sum augmentation (K=2, zero-padded)
    row_pack = jnp.stack([-2.0 * x, -2.0 * y, -2.0 * z, sq, one, zero, zero, zero,
                          rm, v_p, zero, zero, zero, zero, zero, zero], axis=0)
    col_pack = jnp.stack([x, y, z, one, sq, zero, zero, zero,
                          v_p, rm, zero, zero, zero, zero, zero, zero], axis=0)

    # Upper-triangular, ti-major tile schedule (scalar-prefetched to SMEM);
    # consecutive steps share the row block so its DMA is elided.
    nb = npad // tile
    num_tiles = nb * (nb + 1) // 2
    ti_idx, tj_idx = jnp.triu_indices(nb)
    ti_idx = ti_idx.astype(jnp.int32)
    tj_idx = tj_idx.astype(jnp.int32)

    partials = pl.pallas_call(
        functools.partial(_vdw_kernel, tm=tile, tn=tile,
                          cutoff_sq=float(VDW_CUTOFF) ** 2),
        out_shape=jax.ShapeDtypeStruct((num_tiles, 2, tile), jnp.float32),
        grid_spec=pltpu.PrefetchScalarGridSpec(
            num_scalar_prefetch=2,
            grid=(num_tiles,),
            in_specs=[
                pl.BlockSpec((16, tile), lambda t, ti, tj: (0, ti[t])),  # row pack
                pl.BlockSpec((16, tile), lambda t, ti, tj: (0, tj[t])),  # col pack
            ],
            out_specs=pl.BlockSpec((1, 2, tile), lambda t, ti, tj: (t, 0, 0)),
        ),
        compiler_params=pltpu.CompilerParams(
            dimension_semantics=("parallel",),          # megacore split on v7x
            vmem_limit_bytes=vmem_limit_bytes),
    )(ti_idx, tj_idx, row_pack, col_pack)

    # Off-diagonal tile pairs appear twice in the full N x N matrix.
    wts = jnp.where(ti_idx == tj_idx, 1.0, 2.0).astype(jnp.float32)      # (num_tiles,)
    sums = jnp.einsum("t,tkl->k", wts, partials)                         # (2,)
    # torch.sum(relu(dev)**2) / dists[dists < cutoff].numel()
    # (NaN if no pair is below the cutoff — same divide-by-zero as the torch ref.)
    return sums[0] / sums[1]


# --- plain-JAX reference (same math, boolean-indexed like the torch code) ----
def vdw_repulsive_loss_ref(coords, mask, vdw_table):
    L, A, _ = coords.shape
    sel = mask.reshape(-1)
    c = coords.reshape(-1, 3)[sel]
    r = vdw_table[:L].reshape(-1)[sel]
    d = jnp.sqrt(jnp.sum((c[:, None, :] - c[None, :, :]) ** 2, axis=-1))
    d = d + (VDW_CUTOFF + 1.0) * jnp.eye(d.shape[0], dtype=d.dtype)
    dev = (r[:, None] + r[None, :]) / SCALE - d
    return jnp.sum(jnp.maximum(dev, 0.0) ** 2) / jnp.sum(d < VDW_CUTOFF)


if __name__ == "__main__":
    key = jax.random.PRNGKey(0)
    kc, km = jax.random.split(key)

    L, A = 32, len(ALL_ATOMS)           # small synthetic shapes, N = 256 atoms
    coords = jax.random.normal(kc, (L, A, 3), jnp.float32) * 3.0
    mask = jax.random.uniform(km, (L, A)) < 0.7   # "bb + sc" coord mask
    table = _init_table()

    ref = vdw_repulsive_loss_ref(coords, mask, table)

    # Adaptive tile (128 here): exercises the multi-tile upper-triangular
    # schedule with diagonal and off-diagonal tiles.
    loss_auto = jax.block_until_ready(vdw_repulsive_loss(coords, mask, table))
    # Single 512x512 tile with 256 sentinel-padded atoms: exercises padding.
    loss_big = jax.block_until_ready(
        vdw_repulsive_loss(coords, mask, table, tile=512))

    assert jnp.isfinite(loss_auto), loss_auto
    assert jnp.isfinite(loss_big), loss_big
    assert jnp.allclose(loss_auto, ref, rtol=2e-3, atol=5e-4), (loss_auto, ref)
    assert jnp.allclose(loss_big, ref, rtol=2e-3, atol=5e-4), (loss_big, ref)
    print("KERNEL_OK")
</pallas_src>

<mosaic_0001>
module attributes {stable_mosaic.version = 11 : i64} {
  func.func @_vdw_kernel(%arg0: i32, %arg1: memref<3xi32, #tpu.memory_space<smem>>, %arg2: memref<3xi32, #tpu.memory_space<smem>>, %arg3: memref<16x128xf32, #tpu.memory_space<vmem>>, %arg4: memref<16x128xf32, #tpu.memory_space<vmem>>, %arg5: memref<1x2x128xf32, #tpu.memory_space<vmem>>) attributes {dimension_semantics = [#tpu.dimension_semantics<parallel>], iteration_bounds = array<i64: 3>, scalar_prefetch = 2 : i64, scratch_operands = 0 : i64, tpu.core_type = #tpu.core_type<tc>, window_params = [{transform_indices = @transform_0, window_bounds = array<i64: 16, 128>}, {transform_indices = @transform_1, window_bounds = array<i64: 16, 128>}, {transform_indices = @transform_2, window_bounds = array<i64: 1, 2, 128>}]} {
    %0 = arith.index_cast %arg0 : i32 to index
    %1 = memref.load %arg1[%0] : memref<3xi32, #tpu.memory_space<smem>>
    %2 = arith.index_cast %arg0 : i32 to index
    %3 = memref.load %arg2[%2] : memref<3xi32, #tpu.memory_space<smem>>
    %4 = arith.cmpi eq, %1, %3 : i32
    %c0 = arith.constant 0 : index
    %c0_0 = arith.constant 0 : index
    %5 = vector.load %arg3[%c0, %c0_0] : memref<16x128xf32, #tpu.memory_space<vmem>>, vector<8x128xf32>
    %c0_1 = arith.constant 0 : index
    %c0_2 = arith.constant 0 : index
    %6 = vector.load %arg4[%c0_1, %c0_2] : memref<16x128xf32, #tpu.memory_space<vmem>>, vector<8x128xf32>
    %cst = arith.constant dense<0.000000e+00> : vector<128x128xf32>
    %7 = tpu.matmul %5, %6, %cst {dimension_numbers = #tpu.dot_dimension_numbers<[0], [0], [1], [1], [0, 1, 1, 1], [], []>} : vector<8x128xf32>, vector<8x128xf32>, vector<128x128xf32> -> vector<128x128xf32>
    %cst_3 = arith.constant 0.000000e+00 : f32
    %8 = vector.broadcast %cst_3 : f32 to vector<128x128xf32>
    %9 = arith.maximumf %7, %8 : vector<128x128xf32>
    %c8 = arith.constant 8 : index
    %c0_4 = arith.constant 0 : index
    %10 = vector.load %arg3[%c8, %c0_4] : memref<16x128xf32, #tpu.memory_space<vmem>>, vector<8x128xf32>
    %c8_5 = arith.constant 8 : index
    %c0_6 = arith.constant 0 : index
    %11 = vector.load %arg4[%c8_5, %c0_6] : memref<16x128xf32, #tpu.memory_space<vmem>>, vector<8x128xf32>
    %cst_7 = arith.constant dense<0.000000e+00> : vector<128x128xf32>
    %12 = tpu.matmul %10, %11, %cst_7 {dimension_numbers = #tpu.dot_dimension_numbers<[0], [0], [1], [1], [0, 1, 1, 1], [], []>} : vector<8x128xf32>, vector<8x128xf32>, vector<128x128xf32> -> vector<128x128xf32>
    %13 = math.sqrt %9 : vector<128x128xf32>
    %14 = arith.subf %12, %13 : vector<128x128xf32>
    %cst_8 = arith.constant 0.000000e+00 : f32
    %15 = vector.broadcast %cst_8 : f32 to vector<128x128xf32>
    %16 = arith.maximumf %14, %15 : vector<128x128xf32>
    %17 = arith.mulf %16, %16 : vector<128x128xf32>
    %cst_9 = arith.constant 1.600000e+01 : f32
    %18 = vector.broadcast %cst_9 : f32 to vector<128x128xf32>
    %19 = arith.cmpf olt, %9, %18 : vector<128x128xf32>
    %cst_10 = arith.constant 1.000000e+00 : f32
    %cst_11 = arith.constant 0.000000e+00 : f32
    %20 = vector.broadcast %cst_10 : f32 to vector<128x128xf32>
    %21 = vector.broadcast %cst_11 : f32 to vector<128x128xf32>
    %22 = arith.select %19, %20, %21 : vector<128x128xi1>, vector<128x128xf32>
    %cst_12 = arith.constant dense<0.000000e+00> : vector<128xf32>
    %23 = vector.multi_reduction <add>, %17, %cst_12 [0] : vector<128x128xf32> to vector<128xf32>
    %24 = vector.shape_cast %23 : vector<128xf32> to vector<1x128xf32>
    %cst_13 = arith.constant dense<0.000000e+00> : vector<128xf32>
    %25 = vector.multi_reduction <add>, %22, %cst_13 [0] : vector<128x128xf32> to vector<128xf32>
    %26 = vector.shape_cast %25 : vector<128xf32> to vector<1x128xf32>
    %27 = tpu.concatenate %24, %26 in 0 : vector<1x128xf32>, vector<1x128xf32> -> vector<2x128xf32>
    %28 = vector.shape_cast %27 : vector<2x128xf32> to vector<1x2x128xf32>
    %c0_14 = arith.constant 0 : index
    %c0_15 = arith.constant 0 : index
    %c0_16 = arith.constant 0 : index
    %29 = vector.load %arg5[%c0_14, %c0_15, %c0_16] : memref<1x2x128xf32, #tpu.memory_space<vmem>>, vector<1x2x128xf32>
    tpu.vector_store %arg5[%c0_14, %c0_15, %c0_16], %28 {strides = array<i32>} : memref<1x2x128xf32, #tpu.memory_space<vmem>>, vector<1x2x128xf32>,
    %30 = arith.extui %4 : i1 to i32
    %c0_i32 = arith.constant 0 : i32
    %31 = arith.cmpi ne, %30, %c0_i32 : i32
    scf.if %31 {
      %32 = tpu.iota {dimensions = array<i32: 0>} : vector<128x128xi32>
      %33 = tpu.iota {dimensions = array<i32: 1>} : vector<128x128xi32>
      %34 = arith.cmpi eq, %32, %33 : vector<128x128xi32>
      %cst_17 = arith.constant 0.000000e+00 : f32
      %35 = vector.broadcast %cst_17 : f32 to vector<128x128xf32>
      %36 = arith.select %34, %17, %35 : vector<128x128xi1>, vector<128x128xf32>
      %cst_18 = arith.constant dense<0.000000e+00> : vector<128xf32>
      %37 = vector.multi_reduction <add>, %36, %cst_18 [0] : vector<128x128xf32> to vector<128xf32>
      %38 = vector.shape_cast %37 : vector<128xf32> to vector<1x128xf32>
      %cst_19 = arith.constant 0.000000e+00 : f32
      %39 = vector.broadcast %cst_19 : f32 to vector<128x128xf32>
      %40 = arith.select %34, %22, %39 : vector<128x128xi1>, vector<128x128xf32>
      %cst_20 = arith.constant dense<0.000000e+00> : vector<128xf32>
      %41 = vector.multi_reduction <add>, %40, %cst_20 [0] : vector<128x128xf32> to vector<128xf32>
      %42 = vector.shape_cast %41 : vector<128xf32> to vector<1x128xf32>
      %43 = arith.subf %24, %38 : vector<1x128xf32>
      %44 = arith.subf %26, %42 : vector<1x128xf32>
      %45 = tpu.concatenate %43, %44 in 0 : vector<1x128xf32>, vector<1x128xf32> -> vector<2x128xf32>
      %46 = vector.shape_cast %45 : vector<2x128xf32> to vector<1x2x128xf32>
      %c0_21 = arith.constant 0 : index
      %c0_22 = arith.constant 0 : index
      %c0_23 = arith.constant 0 : index
      %47 = vector.load %arg5[%c0_21, %c0_22, %c0_23] : memref<1x2x128xf32, #tpu.memory_space<vmem>>, vector<1x2x128xf32>
      tpu.vector_store %arg5[%c0_21, %c0_22, %c0_23], %46 {strides = array<i32>} : memref<1x2x128xf32, #tpu.memory_space<vmem>>, vector<1x2x128xf32>,
    } else {
    }
    return
  }
  func.func @transform_0(%arg0: i32, %arg1: memref<3xi32, #tpu.memory_space<smem>>, %arg2: memref<3xi32, #tpu.memory_space<smem>>) -> (i32, i32) {
    %0 = arith.index_cast %arg0 : i32 to index
    %1 = memref.load %arg1[%0] : memref<3xi32, #tpu.memory_space<smem>>
    %c0_i32 = arith.constant 0 : i32
    %c0_i32_0 = arith.constant 0 : i32
    return %c0_i32, %1 : i32, i32
  }
  func.func @transform_1(%arg0: i32, %arg1: memref<3xi32, #tpu.memory_space<smem>>, %arg2: memref<3xi32, #tpu.memory_space<smem>>) -> (i32, i32) {
    %0 = arith.index_cast %arg0 : i32 to index
    %1 = memref.load %arg2[%0] : memref<3xi32, #tpu.memory_space<smem>>
    %c0_i32 = arith.constant 0 : i32
    %c0_i32_0 = arith.constant 0 : i32
    return %c0_i32, %1 : i32, i32
  }
  func.func @transform_2(%arg0: i32, %arg1: memref<3xi32, #tpu.memory_space<smem>>, %arg2: memref<3xi32, #tpu.memory_space<smem>>) -> (i32, i32, i32) {
    %c0_i32 = arith.constant 0 : i32
    %c0_i32_0 = arith.constant 0 : i32
    %c0_i32_1 = arith.constant 0 : i32
    return %arg0, %c0_i32, %c0_i32_0 : i32, i32, i32
  }
}

</mosaic_0001>

<bundles_post_ra>
// kernel: tpu_custom_call.1
= control target key start
LH: loop header
LB: loop body
LE: loop exit
PB: predicated region body
PF: predicated region fallthrough
CT: control target
= control target key end

     0   :  { %s1484_s21 = smov [#allocation3]   ;;  %s1485_s22 = smov [#allocation4]   ;;  %s2450_s0 = inlined_call_operand.hbm [shape: s32[3], index: 0, kind: input, shape index: {}]   ;;  %s2451_s2 = inlined_call_operand.hbm [shape: f32[16,256], index: 2, kind: input, shape index: {}]   ;;  %s2452_s3 = inlined_call_operand.hbm [shape: f32[16,256], index: 3, kind: input, shape index: {}]   ;;  %s2453_s4 = inlined_call_operand.hbm [shape: f32[3,2,128], index: 4, kind: output, shape index: {}]   ;;  %s2454_s1 = inlined_call_operand.hbm [shape: s32[3], index: 1, kind: input, shape index: {}]  }
   0x1   :  { %2464 = sst [smem:[#allocation25_spill]] %s2451_s2  ;;  %s10_s17 = sshll.u32 %s2450_s0, 4  ;;  %s11_s17 = int_to_ptr.hbm [resolvable:$true] %s10_s17 }
   0x2   :  { %s15_s20 = sshll.u32 %s2454_s1, 4  ;;  %s16_s20 = int_to_ptr.hbm [resolvable:$true] %s15_s20 }
   0x3   :  { %13 = dma.hbm_to_smem %s11_s17, 16, %s1484_s21, [#allocation2] }
   0x4   :  { %18 = dma.hbm_to_smem %s16_s20, 16, %s1485_s22, [#allocation2] }
   0x5   :  { %1430 = dma.done.wait [#allocation2], 32 }
   0x6   :  { %1431 = vsyncadd [#allocation2], 4294967264 }
   0x7   :  { %21 = sfence }
   0x8   :  { %22 = vsyncpa [#allocation6], 0 }
   0x9   :  { %24 = vsyncpa [#allocation6 + $0x1], 0 }
   0xa   :  { %25 = vsyncpa [#allocation9], 0 }
   0xb   :  { %27 = vsyncpa [#allocation9 + $0x1], 0 }
   0xc   :  { %28 = vsyncpa [#allocation7], 0 }
   0xd   :  { %30 = vsyncpa [#allocation7 + $0x1], 0  ;;  %s1521_s0 = smov 0   ;;  %s1523_s23 = smov 0  }
   0xe   :  { %s1525_s1 = smov 0   ;;  %s1527_s24 = smov 0  }
   0xf   :  { %s1529_s25 = smov 0   ;;  %s1531_s26 = smov 0  }
  0x10   :  { %s1533_s27 = smov 0   ;;  %s1535_s28 = smov 0  }
  0x11   :  { %s1537_s29 = smov 0   ;;  %s1539_s30 = smov 0  }
  0x12 LB: > { %2465 = sst [smem:[#allocation19_spill]] %s1454_s1  ;;  %s1570_s5 = sadd.s32 4294967295, %s1482_s30   ;;  %s1482_s30 = sphi %s1539_s30, %s2501_s30   ;;  %s1478_s29 = sphi %s1537_s29, %s2493_s29   ;;  %s1474_s28 = sphi %s1535_s28, %s2500_s28   ;;  %s1470_s27 = sphi %s1533_s27, %s2499_s27   ;;  %s1466_s26 = sphi %s1531_s26, %s2498_s26   ;;  %s1462_s25 = sphi %s1529_s25, %s2497_s25   ;;  %s1458_s24 = sphi %s1527_s24, %s2496_s24   ;;  %s1454_s1 = sphi %s1525_s1, %s2491_s1   ;;  %s1450_s23 = sphi %s1523_s23, %s2495_s23   ;;  %s1446_s0 = sphi %s1521_s0, %s2494_s0  }
  0x13   : > { %2466 = sst [smem:[#allocation20_spill]] %s1478_s29  ;;  %s1083_s6 = sadd.s32 4294967294, %s1482_s30  }
  0x14   : > { %s1574_s7 = sadd.s32 1, %s1482_s30   ;;  %s40_s8 = sld [smem:[#allocation3 + %s1482_s30]] }
  0x15   : > { %s41_s9 = sld [smem:[#allocation3 + %s1574_s7]]  ;;  %s45_s10 = sadd.s32 1, %s1478_s29 }
  0x16   : > { %p52_p0 = scmp.ne.s32.totalorder %s1478_s29, %s1474_s28  ;;  %p53_p1 = scmp.eq.s32.totalorder %s1482_s30, 0 }
  0x17   : > { %p58_p2 = scmp.ne.s32.totalorder %s1474_s28, %s1470_s27  ;;  %p2460_p3 = scmp.eq.s32.totalorder %s1570_s5, 0 }
  0x18   : > { %p1586_p4 = por %p53_p1, %p52_p0  ;;  %s96_s12 = ssub.s32 %s1482_s30, %s1574_s7 }
  0x19   : > { %p1594_p5 = por %p2460_p3, %p58_p2  ;;  %p97_p6 = scmp.eq.s32.totalorder %s96_s12, 0 }
  0x1a   : > { %s99_s14 = sadd.s32 1, %s1454_s1  ;;  %p109_p7 = scmp.ne.s32.totalorder %s1454_s1, %s1450_s23 }
  0x1b   : > { %s42_s15 = ssub.s32 %s40_s8, %s41_s9  ;;  %p110_p8 = scmp.eq.s32.totalorder %s1570_s5, 2 }
  0x1c   : > { %p43_p9 = scmp.eq.s32.totalorder %s42_s15, 0  ;;  %p115_p10 = scmp.ne.s32.totalorder %s1450_s23, %s1446_s0 }
  0x1d   : > { %s1605_s16 = scalar_select %p97_p6, %s1454_s1, %s99_s14  }
  0x1e   : > { %s1608_s17 = scalar_select %p43_p9, %s1478_s29, %s45_s10  }
  0x1f   : > { %2469 = sst [smem:[#allocation21_spill]] %s1605_s16  ;;  %p1610_p11 = por %p110_p8, %p109_p7 }
  0x20   : > { %2470 = sst [smem:[#allocation22_spill]] %s1608_s17  ;;  %p116_p12 = scmp.eq.s32.totalorder %s1083_s6, 2 }
  0x21   : > { %p2459_p13 = scmp.lt.s32.totalorder %s1482_s30, 3  ;;  %s136_s20 = sand.u32 1, %s1478_s29  }
  0x22   : > { %p1615_p0 = por %p116_p12, %p115_p10  ;;  %s1086_s21 = sshll.u32 %s136_s20, 4 }
  0x23   : > { %p1624_p2 = pnand %p2459_p13, %p1586_p4  ;;  %s140_s6 = scalar_lea.vmem [#allocation5], %s1086_s21 }
  0x24   : > { %s2472_s19 = scalar_select %p1615_p0, 1, 0 }
  0x25   : > { %s1133_s27 = scalar_select %p1586_p4, [#allocation3], [#allocation11] }
  0x26   : > { %2473 = sst [smem:[#allocation23_spill]] %s2472_s19  ;;  %s1637_s9 = sshll.u32 %s140_s6, 4 }
  0x27   : > { %s1134_s8 = scalar_select %p1586_p4, %s1482_s30, 0 }
  0x28   : > { %s2503_s27 = smov (!%p2459_p13, %s1133_s27), [#allocation13]  ;;  %2475 = sst [smem:[#allocation24_spill]] %s1637_s9 }
  0x29   : > { %s2505_s8 = smov (!%p2459_p13, %s1134_s8), 0  ;;  %p1090_p6 = scmp.ge.s32.totalorder %s1482_s30, 1 }
  0x2a   : > { %s141_s10 = sld [smem:[%s2503_s27 + %s2505_s8]]  ;;  %p178_p7 = scmp.lt.s32.totalorder %s1482_s30, 4 }
  0x2b   : > { %s2477_s2 = sld [smem:[#allocation25_spill]]  ;;  %s137_s6 = scalar_lea.sflag [#allocation6], %s136_s20 }
  0x2c   : > { %p1642_p8 = pnand %p1090_p6, %p178_p7  ;;  %s68_s16 = sld [smem:[#allocation4 + %s1482_s30]] }
  0x2d   : > { %s69_s21 = sld [smem:[#allocation4 + %s1574_s7]]  ;;  %p1306_p9 = pneg %p1624_p2 }
  0x30   : > { %s1087_s11 = sshll.u32 %s141_s10, 3 }
  0x31   : > { %s145_s17 = scalar_lea.hbm %s2477_s2, %s1087_s11  ;;  %s1309_s10 = scalar_lea.hbm %s2477_s2, 32 }
  0x32   : > { %s146_s29 = sshll.u32 %s145_s17, 4  ;;  %s147_s29 = int_to_ptr.hbm [resolvable:$true] %s146_s29 }
  0x33   : > { %s1302_s1 = sshra.s32 %s147_s29, 4  ;;  %s1303_s1 = int_to_ptr.hbm [resolvable:$true] %s1302_s1 }
  0x34   : > { %s1304_s27 = scalar_lea.hbm %s1303_s1, 16  ;;  %p1310_p6 = scmp.lt.s32.totalorder %s1303_s1, %s2477_s2 }
  0x35   : > { %p1305_p4 = scmp.ne.s32.totalorder %s1303_s1, %s1304_s27  ;;  %p1311_p7 = scmp.lt.s32.totalorder %s1309_s10, %s1304_s27 }
  0x37   : > { %p1307_p10 = pnand %p1306_p9, %p1305_p4  ;;  %p1312_p13 = por %p1311_p7, %p1310_p6 }
  0x39   : > { %p1308_p12 = pneg %p1307_p10 }
  0x3b   : > { %p1313_p3 = pnand %p1312_p13, %p1308_p12 }
  0x3d   : > { %1316 = shalt.err (!%p1313_p3)
}
  0x3e   : > { %s2461_s17 = smov 256   ;;  %s2478_s20 = sld [smem:[#allocation24_spill]] }
  0x3f   : > { %s2462_s19 = smov 128   ;;  %s2463_s1 = smov 8  }
  0x40   : > { %p80_p3 = scmp.ne.s32.totalorder %s1466_s26, %s1462_s25  ;;  %p86_p13 = scmp.ne.s32.totalorder %s1462_s25, %s1458_s24 }
  0x41   : > { %s158_s11 = sand.u32 1, %s1466_s26   ;;  %p2480_p9 = scmp.eq.s32.totalorder %s1570_s5, 0 }
  0x42   : > { %p82_p4 = por %p80_p3, %p53_p1  ;;  %s70_s27 = ssub.s32 %s68_s16, %s69_s21 }
  0x43   : > { %p1675_p10 = por %p86_p13, %p2480_p9  ;;  %s73_s8 = sadd.s32 1, %s1466_s26 }
  0x44   : > { %s2479_s9 = int_to_ptr.vmem [resolvable:$true] %s2478_s20  ;;  %p71_p12 = scmp.eq.s32.totalorder %s70_s27, 0 }
  0x45   : > { %1148 = dma.hbm_to_vmem [thread:$0]  (!%p1624_p2), %s147_s29, 256, %s2479_s9, %s137_s6, %s2461_s17, %s2462_s19, %s2463_s1  }
  0x46   : > { %s1088_s22 = sshll.u32 %s158_s11, 4  ;;  %p2482_p6 = scmp.lt.s32.totalorder %s1482_s30, 3 }
  0x47   : > { %s1136_s10 = scalar_select %p82_p4, [#allocation4], [#allocation12] }
  0x48   : > { %s1681_s14 = scalar_select %p71_p12, %s1466_s26, %s73_s8  }
  0x49   : > { %s1137_s20 = scalar_select %p82_p4, %s1482_s30, 0 }
  0x4a   : > { %s2507_s10 = smov (!%p2482_p6, %s1136_s10), [#allocation14]  ;;  %p2483_p2 = pmov %p2482_p6 }
  0x4b   : > { %s162_s6 = scalar_lea.vmem [#allocation8], %s1088_s22  ;;  %s159_s19 = scalar_lea.sflag [#allocation9], %s158_s11 }
  0x4c   : > { %s2509_s20 = smov (!%p2483_p2, %s1137_s20), 0  ;;  %p2484_p7 = pmov %p2483_p2 }
  0x4d   : > { %s163_s29 = sld [smem:[%s2507_s10 + %s2509_s20]]  ;;  %s170_s16 = sshll.u32 %s162_s6, 4  ;;  %s171_s16 = int_to_ptr.vmem [resolvable:$true] %s170_s16 }
  0x4e   : > { %p1690_p1 = pnand %p2484_p7, %p82_p4  ;;  %s1339_s20 = scalar_lea.hbm %s2452_s3, 32 }
  0x50   : > { %p1336_p13 = pneg %p1690_p1 }
  0x53   : > { %s1089_s21 = sshll.u32 %s163_s29, 3 }
  0x54   : > { %s167_s8 = scalar_lea.hbm %s2452_s3, %s1089_s21 }
  0x55   : > { %s168_s17 = sshll.u32 %s167_s8, 4  ;;  %s169_s17 = int_to_ptr.hbm [resolvable:$true] %s168_s17 }
  0x56   : > { %s1332_s1 = sshra.s32 %s169_s17, 4  ;;  %s1333_s1 = int_to_ptr.hbm [resolvable:$true] %s1332_s1 }
  0x57   : > { %s1334_s2 = scalar_lea.hbm %s1333_s1, 16  ;;  %p1340_p12 = scmp.lt.s32.totalorder %s1333_s1, %s2452_s3 }
  0x58   : > { %p1335_p3 = scmp.ne.s32.totalorder %s1333_s1, %s1334_s2  ;;  %p1341_p6 = scmp.lt.s32.totalorder %s1339_s20, %s1334_s2 }
  0x5a   : > { %p1337_p4 = pnand %p1336_p13, %p1335_p3  ;;  %p1342_p2 = por %p1341_p6, %p1340_p12 }
  0x5c   : > { %p1338_p9 = pneg %p1337_p4 }
  0x5e   : > { %p1343_p7 = pnand %p1342_p2, %p1338_p9 }
  0x60   : > { %1346 = shalt.err (!%p1343_p7)
}
  0x61   : > { %s2486_s11 = smov 8   ;;  %s2487_s21 = smov 128  }
  0x62   : > { %s2488_s9 = smov 256   ;;  %182 = sbr.rel (%p1642_p8) target bundleno = 747 (0x2eb), region = 28 }
  0x63   : > { %1153 = dma.hbm_to_vmem [thread:$0]  (!%p1690_p1), %s169_s17, 256, %s171_s16, %s159_s19, %s2488_s9, %s2487_s21, %s2486_s11  }
  0x64   : > { %s184_s27 = sand.u32 (!%p1642_p8), 1, %s1474_s28  }
  0x65   : > { %s1091_s8 = sshll.u32 (!%p1642_p8), %s184_s27, 4  ;;  %s185_s10 = scalar_lea.sflag (!%p1642_p8), [#allocation6], %s184_s27 }
  0x66   : > { %s188_s22 = scalar_lea.vmem (!%p1642_p8), [#allocation5], %s1091_s8 }
  0x67   : > { %1433 = dma.done.wait (%p1594_p5), %s185_s10, 256  }
  0x68   : > { %1435 = vsyncadd (%p1594_p5), %s185_s10, 4294967040  ;;  %s194_s2 = sand.u32 1, %s1462_s25  }
  0x69   : > { %s1718_s1 = sshll.u32 %s194_s2, 4  ;;  %s195_s17 = scalar_lea.sflag [#allocation9], %s194_s2 }
  0x6a   : > { %s198_s12 = scalar_lea.vmem [#allocation8], %s1718_s1 }
  0x6b   : > { %1437 = dma.done.wait (%p1675_p10), %s195_s17, 256  }
  0x6c   : > { %1439 = vsyncadd (%p1675_p10), %s195_s17, 4294967040  ;;  %s1726_s19 = sld [smem:[#allocation3 + %s1570_s5]]  ;;  %v230_v0 = vld [vmem:[%s188_s22] sm:$0xff]  ;;  %v394_v2 = vld [vmem:[%s188_s22 + $0x8] sm:$0xff]  ;;  %vm264_vm0 = vcmask 64512   ;;  %s222_s15 = sand.u32 1, %s1450_s23  }
  0x6d   : > { %s1729_s13 = sld [smem:[#allocation4 + %s1570_s5]]  ;;  %232 = vxpose.xlu0.b32.start.end [1/1] (short) %v230_v0, 128  ;;  %v231_v1 = vld [vmem:[%s198_s12] sm:$0xff]  ;;  %v395_v15 = vld [vmem:[%s198_s12 + $0x8] sm:$0xff]  ;;  %s1093_s24 = sshll.u32 %s222_s15, 1 }
  0x6e   : > { %328 = vmatpush.msra.mxu0 %v231_v1  ;;  %1131 = vmatpush.msra.mxu2 %v231_v1  ;;  %s2255_s16 = scalar_lea.vmem [#allocation10], %s1093_s24 }
  0x6f   : > { %491 = vmatpush.msra.mxu1 %v395_v15  ;;  %1132 = vmatpush.msra.mxu3 %v395_v15 }
  0x73   : > { %p1126_p5 = scmp.ne.s32.totalorder %s1726_s19, %s1729_s13 }
  0xed   : > { %396 = vxpose.xlu0.b32.start.end [1/1] (short) %v394_v2, 128 }
 0x111   : > { %v248_v3 = vpop.trf.xlu0 }
 0x112   : > { %1094 = vmatmul.msk.f32.vlgmr.msra.gmra.mxu0 %vm264_vm0, %v248_v3 }
 0x119   : > { %v249_v4 = vpop.trf.xlu0 }
 0x11a   : > { %1095 = vmatmul.msk.f32.gmra.mxu0 %vm264_vm0, %v249_v4 }
 0x121   : > { %v250_v5 = vpop.trf.xlu0 }
 0x122   : > { %1096 = vmatmul.msk.f32.gmra.mxu0 %vm264_vm0, %v250_v5 }
 0x129   : > { %v251_v6 = vpop.trf.xlu0 }
 0x12a   : > { %1097 = vmatmul.msk.f32.gmra.mxu0 %vm264_vm0, %v251_v6 }
 0x131   : > { %v252_v7 = vpop.trf.xlu0 }
 0x132   : > { %1098 = vmatmul.msk.f32.gmra.mxu0 %vm264_vm0, %v252_v7 }
 0x139   : > { %v253_v8 = vpop.trf.xlu0 }
 0x13a   : > { %1099 = vmatmul.msk.f32.gmra.mxu0 %vm264_vm0, %v253_v8 }
 0x141   : > { %v254_v9 = vpop.trf.xlu0 }
 0x142   : > { %1100 = vmatmul.msk.f32.gmra.mxu0 %vm264_vm0, %v254_v9 }
 0x149   : > { %v255_v10 = vpop.trf.xlu0 }
 0x14a   : > { %1101 = vmatmul.msk.f32.gmra.mxu0 %vm264_vm0, %v255_v10 }
 0x151   : > { %v256_v11 = vpop.trf.xlu0 }
 0x152   : > { %1102 = vmatmul.msk.f32.vlgmr.msra.gmra.mxu2 %vm264_vm0, %v256_v11 }
 0x159   : > { %v257_v12 = vpop.trf.xlu0 }
 0x15a   : > { %1103 = vmatmul.msk.f32.gmra.mxu2 %vm264_vm0, %v257_v12 }
 0x161   : > { %v258_v13 = vpop.trf.xlu0 }
 0x162   : > { %1104 = vmatmul.msk.f32.gmra.mxu2 %vm264_vm0, %v258_v13 }
 0x169   : > { %v259_v14 = vpop.trf.xlu0 }
 0x16a   : > { %1105 = vmatmul.msk.f32.gmra.mxu2 %vm264_vm0, %v259_v14 }
 0x171   : > { %v260_v16 = vpop.trf.xlu0 }
 0x172   : > { %1106 = vmatmul.msk.f32.gmra.mxu2 %vm264_vm0, %v260_v16 }
 0x179   : > { %v261_v17 = vpop.trf.xlu0 }
 0x17a   : > { %1107 = vmatmul.msk.f32.gmra.mxu2 %vm264_vm0, %v261_v17 }
 0x181   : > { %v262_v18 = vpop.trf.xlu0 }
 0x182   : > { %1108 = vmatmul.msk.f32.gmra.mxu2 %vm264_vm0, %v262_v18 }
 0x189   : > { %v263_v19 = vpop.trf.xlu0 }
 0x18a   : > { %1109 = vmatmul.msk.f32.gmra.mxu2 %vm264_vm0, %v263_v19  ;;  %v1489_v19 = vmov 0.0  }
 0x18f   : > { %v330_v33 = vpop.f32.mrf.mxu0 }
 0x190   : > { %v1769_v43 = vmax.f32 %v330_v33, 0.0 }
 0x191   : > { %v412_v20 = vpop.trf.xlu0 }
 0x192   : > { %1110 = vmatmul.msk.f32.vlgmr.msra.gmra.mxu1 %vm264_vm0, %v412_v20  ;;  %1246 = vrsqrt.f32 %v1769_v43  ;;  %vm781_vm1 = vcmp.lt.f32.partialorder %v1769_v43, 16.0  ;;  %vm548_vm3 = vcmp.eq.f32.partialorder %v1769_v43, inf  ;;  %vm550_vm4 = vcmp.eq.f32.partialorder %v1769_v43, 0.0 }
 0x193   : > { %v1826_v20 = vsel %vm781_vm1, 1.0, %v1489_v19 }
 0x197   : > { %v333_v36 = vpop.f32.mrf.mxu0 }
 0x198   : > { %v1771_v45 = vmax.f32 %v333_v36, 0.0  ;;  %v1247_v49 = vpop.eup %1246 }
 0x199   : > { %v413_v21 = vpop.trf.xlu0  ;;  %v542_v53 = vmul.f32 %v1247_v49, %v1769_v43 }
 0x19a   : > { %1111 = vmatmul.msk.f32.gmra.mxu1 %vm264_vm0, %v413_v21  ;;  %1248 = vrsqrt.f32 %v1771_v45  ;;  %vm782_vm2 = vcmp.lt.f32.partialorder %v1771_v45, 16.0  ;;  %vm560_vm5 = vcmp.eq.f32.partialorder %v1771_v45, inf  ;;  %vm562_vm6 = vcmp.eq.f32.partialorder %v1771_v45, 0.0 }
 0x19b   : > { %v543_v59 = vmul.f32 %v1247_v49, %v542_v53 }
 0x19d   : > { %v544_v2 = vmul.f32 0.5, %v543_v59 }
 0x19f   : > { %v336_v38 = vpop.f32.mrf.mxu0  ;;  %v545_v9 = vsub.f32 1.5, %v544_v2 }
 0x1a0   : > { %v1774_v46 = vmax.f32 %v336_v38, 0.0  ;;  %v1249_v52 = vpop.eup %1248 }
 0x1a1   : > { %v414_v22 = vpop.trf.xlu0  ;;  %v554_v55 = vmul.f32 %v1249_v52, %v1771_v45  ;;  %v546_v18 = vmul.f32 %v1247_v49, %v545_v9 }
 0x1a2   : > { %1112 = vmatmul.msk.f32.gmra.mxu1 %vm264_vm0, %v414_v22  ;;  %1250 = vrsqrt.f32 %v1774_v46  ;;  %vm783_vm7 = vcmp.lt.f32.partialorder %v1774_v46, 16.0  ;;  %vm572_vm9 = vcmp.eq.f32.partialorder %v1774_v46, inf  ;;  %vm574_vm10 = vcmp.eq.f32.partialorder %v1774_v46, 0.0 }
 0x1a3   : > { %v555_v61 = vmul.f32 %v1249_v52, %v554_v55 }
 0x1a5   : > { %v556_v3 = vmul.f32 0.5, %v555_v61 }
 0x1a7   : > { %v339_v39 = vpop.f32.mrf.mxu0  ;;  %v557_v11 = vsub.f32 1.5, %v556_v3 }
 0x1a8   : > { %v1782_v50 = vmax.f32 %v339_v39, 0.0  ;;  %v1251_v56 = vpop.eup %1250 }
 0x1a9   : > { %v415_v23 = vpop.trf.xlu0  ;;  %v566_v62 = vmul.f32 %v1251_v56, %v1774_v46  ;;  %v558_v21 = vmul.f32 %v1249_v52, %v557_v11 }
 0x1aa   : > { %1113 = vmatmul.msk.f32.gmra.mxu1 %vm264_vm0, %v415_v23  ;;  %1252 = vrsqrt.f32 %v1782_v50  ;;  %v1830_v23 = vsel %vm782_vm2, 1.0, %v1489_v19  ;;  %vm784_vm8 = vcmp.lt.f32.partialorder %v1782_v50, 16.0  ;;  %vm584_vm12 = vcmp.eq.f32.partialorder %v1782_v50, inf }
 0x1ab   : > { %v567_v4 = vmul.f32 %v1251_v56, %v566_v62  ;;  %v834_v33 = vadd.f32 %v1830_v23, %v1826_v20  ;;  %v1875_v53 = vsel %vm784_vm8, 1.0, %v1489_v19  ;;  %vm586_vm13 = vcmp.eq.f32.partialorder %v1782_v50, 0.0 }
 0x1ad   : > { %v568_v12 = vmul.f32 0.5, %v567_v4 }
 0x1af   : > { %v342_v41 = vpop.f32.mrf.mxu0  ;;  %v569_v22 = vsub.f32 1.5, %v568_v12 }
 0x1b0   : > { %v1785_v54 = vmax.f32 %v342_v41, 0.0  ;;  %v1799_v0 = vpop.eup %1252 }
 0x1b1   : > { %v416_v24 = vpop.trf.xlu0  ;;  %v578_v6 = vmul.f32 %v1799_v0, %v1782_v50 }
 0x1b2   : > { %1114 = vmatmul.msk.f32.gmra.mxu1 %vm264_vm0, %v416_v24  ;;  %1254 = vrsqrt.f32 %v1785_v54  ;;  %vm785_vm11 = vcmp.lt.f32.partialorder %v1785_v54, 16.0  ;;  %vm596_vm15 = vcmp.eq.f32.partialorder %v1785_v54, inf  ;;  %vm598_vm1 = vcmp.eq.f32.partialorder %v1785_v54, 0.0 }
 0x1b3   : > { %v579_v13 = vmul.f32 %v1799_v0, %v578_v6  ;;  %v587_v6 = vand.u32 2147483648, %v1782_v50  ;;  %v1897_v11 = vsel %vm785_vm11, 1.0, %v1489_v19 }
 0x1b5   : > { %v580_v24 = vmul.f32 0.5, %v579_v13 }
 0x1b7   : > { %v345_v44 = vpop.f32.mrf.mxu0  ;;  %v581_v38 = vsub.f32 1.5, %v580_v24 }
 0x1b8   : > { %v1793_v60 = vmax.f32 %v345_v44, 0.0  ;;  %v1807_v7 = vpop.eup %1254  ;;  %v1863_v44 = vsel %vm783_vm7, 1.0, %v1489_v19 }
 0x1b9   : > { %v417_v25 = vpop.trf.xlu0  ;;  %v590_v14 = vmul.f32 %v1807_v7, %v1785_v54  ;;  %v582_v59 = vmul.f32 %v1799_v0, %v581_v38 }
 0x1ba   : > { %1115 = vmatmul.msk.f32.gmra.mxu1 %vm264_vm0, %v417_v25  ;;  %1256 = vrsqrt.f32 %v1793_v60  ;;  %vm786_vm14 = vcmp.lt.f32.partialorder %v1793_v60, 16.0  ;;  %vm608_vm2 = vcmp.eq.f32.partialorder %v1793_v60, inf }
 0x1bb   : > { %v591_v25 = vmul.f32 %v1807_v7, %v590_v14  ;;  %v583_v14 = vmul.f32 %v582_v59, %v1782_v50 }
 0x1bd   : > { %v592_v39 = vmul.f32 0.5, %v591_v25 }
 0x1bf   : > { %v348_v51 = vpop.f32.mrf.mxu0  ;;  %v593_v61 = vsub.f32 1.5, %v592_v39 }
 0x1c0   : > { %v1797_v63 = vmax.f32 %v348_v51, 0.0  ;;  %v1818_v15 = vpop.eup %1256 }
 0x1c1   : > { %v418_v26 = vpop.trf.xlu0 }
 0x1c2   : > { %1116 = vmatmul.msk.f32.gmra.mxu1 %vm264_vm0, %v418_v26  ;;  %1258 = vrsqrt.f32 %v1797_v63  ;;  %v602_v26 = vmul.f32 %v1818_v15, %v1793_v60 }
 0x1c7   : > { %v351_v1 = vpop.f32.mrf.mxu0 }
 0x1c8   : > { %v1802_v5 = vmax.f32 %v351_v1, 0.0  ;;  %v1823_v17 = vpop.eup %1258  ;;  %v835_v1 = vadd.f32 %v834_v33, %v1863_v44 }
 0x1c9   : > { %v419_v27 = vpop.trf.xlu0 }
 0x1ca   : > { %1117 = vmatmul.msk.f32.gmra.mxu1 %vm264_vm0, %v419_v27  ;;  %1260 = vrsqrt.f32 %v1802_v5  ;;  %v551_v27 = vand.u32 2147483648, %v1769_v43  ;;  %v836_v0 = vadd.f32 %v835_v1, %v1875_v53  ;;  %vm632_vm7 = vcmp.eq.f32.partialorder %v1802_v5, inf }
 0x1cb   : > { %vm634_vm8 = vcmp.eq.f32.partialorder %v1802_v5, 0.0 }
 0x1d1   : > { %v420_v28 = vpop.trf.xlu0 }
 0x1d2   : > { %1118 = vmatmul.msk.f32.vlgmr.msra.gmra.mxu3 %vm264_vm0, %v420_v28  ;;  %v614_v28 = vmul.f32 %v1823_v17, %v1797_v63 }
 0x1d4   : > { %v615_v41 = vmul.f32 %v1823_v17, %v614_v28 }
 0x1d5   : > { %v354_v40 = vpop.f32.mrf.mxu2 }
 0x1d6   : > { %v1821_v16 = vmax.f32 %v354_v40, 0.0  ;;  %v603_v40 = vmul.f32 %v1818_v15, %v602_v26  ;;  %v616_v3 = vmul.f32 0.5, %v615_v41  ;;  %v837_v26 = vadd.f32 %v836_v0, %v1897_v11 }
 0x1d8   : > { %1262 = vrsqrt.f32 %v1821_v16  ;;  %v604_v62 = vmul.f32 0.5, %v603_v40  ;;  %v617_v24 = vsub.f32 1.5, %v616_v3  ;;  %vm644_vm11 = vcmp.eq.f32.partialorder %v1821_v16, inf }
 0x1d9   : > { %v421_v29 = vpop.trf.xlu0 }
 0x1da   : > { %1119 = vmatmul.msk.f32.gmra.mxu3 %vm264_vm0, %v421_v29  ;;  %v1841_v29 = vpop.eup %1260 }
 0x1dd   : > { %v1767_v42 = vpop.f32.mrf.mxu2 }
 0x1de   : > { %v1872_v52 = vpop.eup %1262 }
 0x1df   : > { %v638_v9 = vmul.f32 %v1872_v52, %v1821_v16 }
 0x1e1   : > { %v422_v30 = vpop.trf.xlu0 }
 0x1e2   : > { %1120 = vmatmul.msk.f32.gmra.mxu3 %vm264_vm0, %v422_v30  ;;  %v1844_v30 = vmax.f32 %v1767_v42, 0.0  ;;  %v626_v42 = vmul.f32 %v1841_v29, %v1802_v5 }
 0x1e4   : > { %1264 = vrsqrt.f32 %v1844_v30  ;;  %v627_v4 = vmul.f32 %v1841_v29, %v626_v42 }
 0x1e5   : > { %v1776_v47 = vpop.f32.mrf.mxu2 }
 0x1e6   : > { %v1866_v49 = vmax.f32 %v1776_v47, 0.0  ;;  %v575_v47 = vand.u32 2147483648, %v1774_v46  ;;  %v628_v25 = vmul.f32 0.5, %v627_v4  ;;  %v623_v4 = vand.u32 2147483648, %v1797_v63 }
 0x1e8   : > { %1266 = vrsqrt.f32 %v1866_v49  ;;  %v629_v41 = vsub.f32 1.5, %v628_v25 }
 0x1e9   : > { %v423_v31 = vpop.trf.xlu0 }
 0x1ea   : > { %1121 = vmatmul.msk.f32.gmra.mxu3 %vm264_vm0, %v423_v31  ;;  %v547_v31 = vmul.f32 %v546_v18, %v1769_v43  ;;  %v1907_v13 = vpop.eup %1264  ;;  %v594_v18 = vmul.f32 %v1807_v7, %v593_v61  ;;  %v599_v7 = vand.u32 2147483648, %v1785_v54  ;;  %v630_v3 = vmul.f32 %v1841_v29, %v629_v41 }
 0x1ec   : > { %v549_v51 = vsel %vm548_vm3, %v1769_v43, %v547_v31  ;;  %v595_v38 = vmul.f32 %v594_v18, %v1785_v54  ;;  %vm610_vm3 = vcmp.eq.f32.partialorder %v1793_v60, 0.0 }
 0x1ed   : > { %v1789_v57 = vpop.f32.mrf.mxu2  ;;  %v1887_v2 = vsel %vm550_vm4, %v551_v27, %v549_v51  ;;  %vm788_vm4 = vcmp.lt.f32.partialorder %v1802_v5, 16.0 }
 0x1ee   : > { %v1982_v0 = vsel %vm788_vm4, 1.0, %v1489_v19 }
 0x1f1   : > { %v424_v32 = vpop.trf.xlu0 }
 0x1f2   : > { %1122 = vmatmul.msk.f32.gmra.mxu3 %vm264_vm0, %v424_v32  ;;  %v563_v32 = vand.u32 2147483648, %v1771_v45 }
 0x1f5   : > { %v1809_v8 = vpop.f32.mrf.mxu2 }
 0x1f6   : > { %v1932_v33 = vmax.f32 %v1809_v8, 0.0  ;;  %v618_v8 = vmul.f32 %v1823_v17, %v617_v24 }
 0x1f8   : > { %v619_v1 = vmul.f32 %v618_v8, %v1797_v63 }
 0x1f9   : > { %v425_v34 = vpop.trf.xlu0 }
 0x1fa   : > { %1123 = vmatmul.msk.f32.gmra.mxu3 %vm264_vm0, %v425_v34  ;;  %v559_v34 = vmul.f32 %v558_v21, %v1771_v45  ;;  %v605_v21 = vsub.f32 1.5, %v604_v62  ;;  %v597_v62 = vsel %vm596_vm15, %v1785_v54, %v595_v38  ;;  %vm658_vm15 = vcmp.eq.f32.partialorder %v1844_v30, 0.0 }
 0x1fb   : > { %v1988_v18 = vsel %vm598_vm1, %v599_v7, %v597_v62  ;;  %vm668_vm1 = vcmp.eq.f32.partialorder %v1866_v49, inf }
 0x1fc   : > { %v561_v55 = vsel %vm560_vm5, %v1771_v45, %v559_v34  ;;  %v1915_v45 = vmax.f32 %v1789_v57, 0.0  ;;  %v1928_v57 = vsel %vm786_vm14, 1.0, %v1489_v19  ;;  %v1937_v34 = vpop.eup %1266  ;;  %v606_v39 = vmul.f32 %v1818_v15, %v605_v21 }
 0x1fd   : > { %v369_v36 = vpop.f32.mrf.mxu2  ;;  %v1901_v43 = vsel %vm562_vm6, %v563_v32, %v561_v55  ;;  %v639_v32 = vmul.f32 %v1872_v52, %v638_v9  ;;  %v838_v42 = vadd.f32 %v837_v26, %v1928_v57  ;;  %v611_v55 = vand.u32 2147483648, %v1793_v60 }
 0x1fe   : > { %v1945_v40 = vmax.f32 %v369_v36, 0.0  ;;  %1268 = vrsqrt.f32 %v1915_v45  ;;  %v662_v17 = vmul.f32 %v1937_v34, %v1866_v49  ;;  %v607_v59 = vmul.f32 %v606_v39, %v1793_v60 }
 0x1ff   : > { %1270 = vrsqrt.f32 %v1932_v33  ;;  %vm620_vm5 = vcmp.eq.f32.partialorder %v1797_v63, inf  ;;  %vm622_vm6 = vcmp.eq.f32.partialorder %v1797_v63, 0.0  ;;  %v631_v26 = vmul.f32 %v630_v3, %v1802_v5 }
 0x200   : > { %1272 = vrsqrt.f32 %v1945_v40  ;;  %v609_v24 = vsel %vm608_vm2, %v1793_v60, %v607_v59  ;;  %v621_v54 = vsel %vm620_vm5, %v1797_v63, %v619_v1  ;;  %vm656_vm14 = vcmp.eq.f32.partialorder %v1844_v30, inf }
 0x201   : > { %v426_v35 = vpop.trf.xlu0  ;;  %v2016_v39 = vsel %vm610_vm3, %v611_v55, %v609_v24  ;;  %v633_v55 = vsel %vm632_vm7, %v1802_v5, %v631_v26  ;;  %vm670_vm2 = vcmp.eq.f32.partialorder %v1866_v49, 0.0  ;;  %vm793_vm3 = vcmp.lt.f32.partialorder %v1932_v33, 16.0 }
 0x202   : > { %1124 = vmatmul.msk.f32.gmra.mxu3 %vm264_vm0, %v426_v35  ;;  %v570_v35 = vmul.f32 %v1251_v56, %v569_v22  ;;  %vm680_vm4 = vcmp.eq.f32.partialorder %v1915_v45, inf  ;;  %vm692_vm5 = vcmp.eq.f32.partialorder %v1932_v33, inf  ;;  %vm704_vm7 = vcmp.eq.f32.partialorder %v1945_v40, inf }
 0x204   : > { %v571_v56 = vmul.f32 %v570_v35, %v1774_v46  ;;  %v585_v35 = vsel %vm584_vm12, %v1782_v50, %v583_v14  ;;  %v1979_v9 = vpop.eup %1268  ;;  %v663_v14 = vmul.f32 %v1937_v34, %v662_v17  ;;  %vm646_vm12 = vcmp.eq.f32.partialorder %v1821_v16, 0.0 }
 0x205   : > { %v372_v27 = vpop.f32.mrf.mxu2  ;;  %v1997_v25 = vpop.eup %1270 }
 0x206   : > { %v573_v12 = vsel %vm572_vm9, %v1774_v46, %v571_v56  ;;  %v650_v46 = vmul.f32 %v1907_v13, %v1844_v30  ;;  %v640_v56 = vmul.f32 0.5, %v639_v32  ;;  %v1955_v15 = vmax.f32 %v372_v27, 0.0 }
 0x207   : > { %v1921_v28 = vsel %vm574_vm10, %v575_v47, %v573_v12  ;;  %v1964_v47 = vsel %vm586_vm13, %v587_v6, %v585_v35  ;;  %vm789_vm9 = vcmp.lt.f32.partialorder %v1821_v16, 16.0  ;;  %v635_v27 = vand.u32 2147483648, %v1802_v5  ;;  %v2010_v35 = vpop.eup %1272 }
 0x208   : > { %v651_v36 = vmul.f32 %v1907_v13, %v650_v46  ;;  %v641_v6 = vsub.f32 1.5, %v640_v56  ;;  %1274 = vrsqrt.f32 %v1955_v15  ;;  %vm790_vm10 = vcmp.lt.f32.partialorder %v1844_v30, 16.0 }
 0x209   : > { %v427_v37 = vpop.trf.xlu0  ;;  %v674_v46 = vmul.f32 %v1979_v9, %v1915_v45  ;;  %v664_v41 = vmul.f32 0.5, %v663_v14  ;;  %v2023_v56 = vsel %vm622_vm6, %v623_v4, %v621_v54  ;;  %v2033_v60 = vsel %vm790_vm10, 1.0, %v1489_v19 }
 0x20a   : > { %1125 = vmatmul.msk.f32.gmra.mxu3 %vm264_vm0, %v427_v37  ;;  %vm787_vm0 = vcmp.lt.f32.partialorder %v1797_v63, 16.0  ;;  %v652_v12 = vmul.f32 0.5, %v651_v36  ;;  %v642_v32 = vmul.f32 %v1872_v52, %v641_v6  ;;  %v686_v36 = vmul.f32 %v1997_v25, %v1932_v33 }
 0x20b   : > { %v1951_v51 = vsel %vm787_vm0, 1.0, %v1489_v19  ;;  %v647_v63 = vand.u32 2147483648, %v1821_v16  ;;  %vm791_vm13 = vcmp.lt.f32.partialorder %v1866_v49, 16.0  ;;  %v675_v62 = vmul.f32 %v1979_v9, %v674_v46 }
 0x20c   : > { %v839_v50 = vadd.f32 %v838_v42, %v1951_v51  ;;  %v653_v8 = vsub.f32 1.5, %v652_v12  ;;  %v2019_v42 = vsel %vm789_vm9, 1.0, %v1489_v19  ;;  %v643_v59 = vmul.f32 %v642_v32, %v1821_v16 }
 0x20d   : > { %v375_v29 = vpop.f32.mrf.mxu2  ;;  %v698_v1 = vmul.f32 %v2010_v35, %v1945_v40  ;;  %v665_v4 = vsub.f32 1.5, %v664_v41  ;;  %v2050_v6 = vsel %vm634_vm8, %v635_v27, %v633_v55  ;;  %v687_v12 = vmul.f32 %v1997_v25, %v686_v36 }
 0x20e   : > { %v840_v7 = vadd.f32 %v839_v50, %v1982_v0  ;;  %v2012_v38 = vmax.f32 %v375_v29, 0.0  ;;  %v2030_v17 = vpop.eup %1274  ;;  %v654_v50 = vmul.f32 %v1907_v13, %v653_v8  ;;  %v2058_v24 = vsel %vm791_vm13, 1.0, %v1489_v19 }
 0x20f   : > { %v1778_v48 = vpop.f32.mrf.mxu1  ;;  %v710_v14 = vmul.f32 %v2030_v17, %v1955_v15  ;;  %v659_v13 = vand.u32 2147483648, %v1844_v30  ;;  %vm792_vm0 = vcmp.lt.f32.partialorder %v1915_v45, 16.0  ;;  %v645_v54 = vsel %vm644_vm11, %v1821_v16, %v643_v59 }
 0x210   : > { %v841_v3 = vadd.f32 %v840_v7, %v2019_v42  ;;  %1276 = vrsqrt.f32 %v2012_v38  ;;  %v676_v26 = vmul.f32 0.5, %v675_v62  ;;  %v699_v27 = vmul.f32 %v2010_v35, %v698_v1 }
 0x211   : > { %v655_v32 = vmul.f32 %v654_v50, %v1844_v30  ;;  %v666_v46 = vmul.f32 %v1937_v34, %v665_v4  ;;  %v671_v8 = vand.u32 2147483648, %v1866_v49  ;;  %v688_v36 = vmul.f32 0.5, %v687_v12 }
 0x212   : > { %v842_v29 = vadd.f32 %v841_v3, %v2033_v60  ;;  %v711_v55 = vmul.f32 %v2030_v17, %v710_v14  ;;  %v2087_v34 = vsel %vm646_vm12, %v647_v63, %v645_v54  ;;  %v2093_v1 = vsel %vm792_vm0, 1.0, %v1489_v19 }
 0x213   : > { %v677_v3 = vsub.f32 1.5, %v676_v26  ;;  %v683_v50 = vand.u32 2147483648, %v1915_v45  ;;  %v700_v4 = vmul.f32 0.5, %v699_v27  ;;  %v657_v16 = vsel %vm656_vm14, %v1844_v30, %v655_v32 }
 0x214   : > { %v843_v59 = vadd.f32 %v842_v29, %v2058_v24  ;;  %v712_v63 = vmul.f32 0.5, %v711_v55  ;;  %vm682_vm6 = vcmp.eq.f32.partialorder %v1915_v45, 0.0  ;;  %vm694_vm8 = vcmp.eq.f32.partialorder %v1932_v33, 0.0 }
 0x215   : > { %v678_v27 = vmul.f32 %v1979_v9, %v677_v3  ;;  %v701_v32 = vsub.f32 1.5, %v700_v4  ;;  %vm794_vm9 = vcmp.lt.f32.partialorder %v1945_v40, 16.0  ;;  %vm706_vm10 = vcmp.eq.f32.partialorder %v1945_v40, 0.0 }
 0x216   : > { %v2079_v62 = vpop.eup %1276  ;;  %v844_v14 = vadd.f32 %v843_v59, %v2093_v1  ;;  %vm795_vm11 = vcmp.lt.f32.partialorder %v1955_v15, 16.0  ;;  %vm716_vm12 = vcmp.eq.f32.partialorder %v1955_v15, inf  ;;  %vm796_vm13 = vcmp.lt.f32.partialorder %v2012_v38, 16.0 }
 0x217   : > { %v1791_v58 = vpop.f32.mrf.mxu1  ;;  %v722_v12 = vmul.f32 %v2079_v62, %v2012_v38  ;;  %vm718_vm14 = vcmp.eq.f32.partialorder %v1955_v15, 0.0  ;;  %vm730_vm0 = vcmp.eq.f32.partialorder %v2012_v38, 0.0 }
 0x218   : > { %v734_v7 = vsub.f32 %v1791_v58, %v1901_v43  ;;  %v733_v58 = vsub.f32 %v1778_v48, %v1887_v2  ;;  %v667_v2 = vmul.f32 %v666_v46, %v1866_v49 }
 0x219   : > { %v723_v59 = vmul.f32 %v2079_v62, %v722_v12 }
 0x21a   : > { %v750_v48 = vmax.f32 %v734_v7, 0.0  ;;  %v749_v29 = vmax.f32 %v733_v58, 0.0  ;;  %v695_v7 = vand.u32 2147483648, %v1932_v33 }
 0x21c   : > { %v2116_v46 = vmul.f32 %v750_v48, %v750_v48  ;;  %v702_v48 = vmul.f32 %v2010_v35, %v701_v32 }
 0x21f   : > { %v1811_v10 = vpop.f32.mrf.mxu1 }
 0x220   : > { %v735_v43 = vsub.f32 %v1811_v10, %v1921_v28  ;;  %v689_v28 = vsub.f32 1.5, %v688_v36 }
 0x222   : > { %v751_v54 = vmax.f32 %v735_v43, 0.0  ;;  %v690_v9 = vmul.f32 %v1997_v25, %v689_v28  ;;  %v2129_v43 = vmul.f32 %v749_v29, %v749_v29  ;;  %v679_v25 = vmul.f32 %v678_v27, %v1915_v45 }
 0x224   : > { %v2131_v3 = vmul.f32 %v751_v54, %v751_v54 }
 0x227   : > { %v1854_v37 = vpop.f32.mrf.mxu1 }
 0x228   : > { %v736_v10 = vsub.f32 %v1854_v37, %v1964_v47  ;;  %v2110_v37 = vsel %vm793_vm3, 1.0, %v1489_v19  ;;  %v660_v47 = vsel %vm658_vm15, %v659_v13, %v657_v16  ;;  %v713_v13 = vsub.f32 1.5, %v712_v63 }
 0x229   : > { %v845_v58 = vadd.f32 %v844_v14, %v2110_v37  ;;  %v703_v14 = vmul.f32 %v702_v48, %v1945_v40  ;;  %vm728_vm15 = vcmp.eq.f32.partialorder %v2012_v38, inf }
 0x22a   : > { %v752_v36 = vmax.f32 %v736_v10, 0.0  ;;  %v813_v10 = vadd.f32 %v2116_v46, %v2129_v43 }
 0x22c   : > { %v2143_v16 = vmul.f32 %v752_v36, %v752_v36  ;;  %v814_v35 = vadd.f32 %v813_v10, %v2131_v3 }
 0x22e   : > { %v815_v29 = vadd.f32 %v814_v35, %v2143_v16 }
 0x22f   : > { %v1923_v31 = vpop.f32.mrf.mxu1 }
 0x230   : > { %v737_v26 = vsub.f32 %v1923_v31, %v1988_v18  ;;  %v669_v31 = vsel %vm668_vm1, %v1866_v49, %v667_v2  ;;  %v714_v49 = vmul.f32 %v2030_v17, %v713_v13  ;;  %v707_v17 = vand.u32 2147483648, %v1945_v40 }
 0x231   : > { %v672_v4 = vsel %vm670_vm2, %v671_v8, %v669_v31  ;;  %v705_v13 = vsel %vm704_vm7, %v1945_v40, %v703_v14  ;;  %v2217_v40 = vsel %vm796_vm13, 1.0, %v1489_v19  ;;  %vm855_vm1 = vcmask 1040384  }
 0x232   : > { %v715_v32 = vmul.f32 %v714_v49, %v1955_v15 }
 0x237   : > { %v1990_v21 = vpop.f32.mrf.mxu1 }
 0x238   : > { %v738_v55 = vsub.f32 %v1990_v21, %v2016_v39  ;;  %v753_v21 = vmax.f32 %v737_v26, 0.0 }
 0x23a   : > { %v754_v2 = vmax.f32 %v738_v55, 0.0  ;;  %v2151_v8 = vmul.f32 %v753_v21, %v753_v21  ;;  %v2173_v55 = vsel %vm794_vm9, 1.0, %v1489_v19 }
 0x23c   : > { %v2163_v54 = vmul.f32 %v754_v2, %v754_v2  ;;  %v816_v31 = vadd.f32 %v815_v29, %v2151_v8 }
 0x23e   : > { %v817_v21 = vadd.f32 %v816_v31, %v2163_v54 }
 0x23f   : > { %v2063_v5 = vpop.f32.mrf.mxu1 }
 0x240   : > { %v739_v39 = vsub.f32 %v2063_v5, %v2023_v56  ;;  %v691_v56 = vmul.f32 %v690_v9, %v1932_v33  ;;  %v724_v5 = vmul.f32 0.5, %v723_v59  ;;  %v2190_v59 = vsel %vm795_vm11, 1.0, %v1489_v19 }
 0x242   : > { %v755_v63 = vmax.f32 %v739_v39, 0.0  ;;  %v725_v36 = vsub.f32 1.5, %v724_v5 }
 0x247   : > { %v514_v18 = vpop.f32.mrf.mxu1 }
 0x248   : > { %v740_v28 = vsub.f32 %v514_v18, %v2050_v6  ;;  %v681_v6 = vsel %vm680_vm4, %v1915_v45, %v679_v25  ;;  %v2176_v18 = vmul.f32 %v755_v63, %v755_v63  ;;  %v726_v25 = vmul.f32 %v2079_v62, %v725_v36 }
 0x249   : > { %v731_v36 = vand.u32 2147483648, %v2012_v38 }
 0x24a   : > { %v756_v26 = vmax.f32 %v740_v28, 0.0  ;;  %v818_v48 = vadd.f32 %v817_v21, %v2176_v18 }
 0x24c   : > { %v2193_v39 = vmul.f32 %v756_v26, %v756_v26 }
 0x24e   : > { %v819_v62 = vadd.f32 %v818_v48, %v2193_v39 }
 0x255   : > { %v1912_v22 = vpop.f32.mrf.mxu3 }
 0x256   : > { %v741_v12 = vsub.f32 %v1912_v22, %v2087_v34  ;;  %v693_v22 = vsel %vm692_vm5, %v1932_v33, %v691_v56  ;;  %v708_v56 = vsel %vm706_vm10, %v707_v17, %v705_v13  ;;  %v719_v33 = vand.u32 2147483648, %v1955_v15 }
 0x257   : > { %v696_v45 = vsel %vm694_vm8, %v695_v7, %v693_v22 }
 0x258   : > { %v757_v9 = vmax.f32 %v741_v12, 0.0  ;;  %v727_v12 = vmul.f32 %v726_v25, %v2012_v38 }
 0x25a   : > { %v2202_v10 = vmul.f32 %v757_v9, %v757_v9 }
 0x25d   : > { %v1968_v61 = vpop.f32.mrf.mxu3 }
 0x25e   : > { %v742_v27 = vsub.f32 %v1968_v61, %v660_v47  ;;  %v684_v47 = vsel %vm682_vm6, %v683_v50, %v681_v6  ;;  %v717_v50 = vsel %vm716_vm12, %v1955_v15, %v715_v32  ;;  %v820_v15 = vadd.f32 %v819_v62, %v2202_v10 }
 0x25f   : > { %v720_v63 = vsel %vm718_vm14, %v719_v33, %v717_v50  ;;  %v729_v32 = vsel %vm728_vm15, %v2012_v38, %v727_v12 }
 0x260   : > { %v732_v13 = vsel %vm730_vm0, %v731_v36, %v729_v32 }
 0x265   : > { %v2026_v52 = vpop.f32.mrf.mxu3 }
 0x266   : > { %v743_v61 = vsub.f32 %v2026_v52, %v672_v4  ;;  %v758_v52 = vmax.f32 %v742_v27, 0.0 }
 0x268   : > { %v759_v2 = vmax.f32 %v743_v61, 0.0  ;;  %v2211_v7 = vmul.f32 %v758_v52, %v758_v52 }
 0x26a   : > { %v821_v17 = vadd.f32 %v820_v15, %v2211_v7 }
 0x26d   : > { %v2075_v41 = vpop.f32.mrf.mxu3 }
 0x26e   : > { %v744_v4 = vsub.f32 %v2075_v41, %v684_v47  ;;  %v846_v41 = vadd.f32 %v845_v58, %v2173_v55  ;;  %v2221_v58 = vmul.f32 %v759_v2, %v759_v2 }
 0x270   : > { %v760_v49 = vmax.f32 %v744_v4, 0.0  ;;  %v822_v19 = vadd.f32 %v821_v17, %v2221_v58 }
 0x272   : > { %v2224_v29 = vmul.f32 %v760_v49, %v760_v49 }
 0x274   : > { %v823_v31 = vadd.f32 %v822_v19, %v2224_v29 }
 0x275   : > { %v2124_v30 = vpop.f32.mrf.mxu3 }
 0x276   : > { %v745_v28 = vsub.f32 %v2124_v30, %v696_v45  ;;  %v847_v30 = vadd.f32 %v846_v41, %v2190_v59 }
 0x278   : > { %v761_v6 = vmax.f32 %v745_v28, 0.0  ;;  %v848_v27 = vadd.f32 %v847_v30, %v2217_v40 }
 0x27a   : > { %v2229_v22 = vmul.f32 %v761_v6, %v761_v6  ;;  %v849_v61 = vrot.slane %v848_v27, 4 }
 0x27c   : > { %v824_v21 = vadd.f32 %v823_v31, %v2229_v22  ;;  %v850_v25 = vadd.f32 %v849_v61, %v848_v27 }
 0x27d   : > { %v532_v34 = vpop.f32.mrf.mxu3 }
 0x27e   : > { %v746_v5 = vsub.f32 %v532_v34, %v708_v56  ;;  %v851_v28 = vrot.slane %v850_v25, 2 }
 0x280   : > { %v762_v26 = vmax.f32 %v746_v5, 0.0  ;;  %v852_v41 = vadd.f32 %v851_v28, %v850_v25 }
 0x282   : > { %v2234_v9 = vmul.f32 %v762_v26, %v762_v26  ;;  %v853_v5 = vrot.slane %v852_v41, 1 }
 0x284   : > { %v825_v45 = vadd.f32 %v824_v21, %v2234_v9  ;;  %v2250_v12 = vadd.f32 %v853_v5, %v852_v41 }
 0x285   : > { %v535_v35 = vpop.f32.mrf.mxu3 }
 0x286   : > { %v747_v14 = vsub.f32 %v535_v35, %v720_v63 }
 0x288   : > { %v763_v34 = vmax.f32 %v747_v14, 0.0 }
 0x28a   : > { %v2238_v52 = vmul.f32 %v763_v34, %v763_v34 }
 0x28c   : > { %v826_v48 = vadd.f32 %v825_v45, %v2238_v52 }
 0x28d   : > { %v538_v47 = vpop.f32.mrf.mxu3 }
 0x28e   : > { %v748_v4 = vsub.f32 %v538_v47, %v732_v13 }
 0x290   : > { %v764_v50 = vmax.f32 %v748_v4, 0.0 }
 0x292   : > { %v2242_v2 = vmul.f32 %v764_v50, %v764_v50 }
 0x294   : > { %v827_v38 = vadd.f32 %v826_v48, %v2242_v2 }
 0x296   : > { %v828_v56 = vrot.slane %v827_v38, 4 }
 0x298   : > { %v829_v33 = vadd.f32 %v828_v56, %v827_v38 }
 0x29a   : > { %v830_v62 = vrot.slane %v829_v33, 2 }
 0x29c   : > { %v831_v49 = vadd.f32 %v830_v62, %v829_v33 }
 0x29e   : > { %v832_v35 = vrot.slane %v831_v49, 1 }
 0x29f   : > { %860 = sbr.rel (%p1126_p5) target bundleno = 732 (0x2dc), region = 40 }
 0x2a0   : > { %v2248_v63 = vadd.f32 %v832_v35, %v831_v49 }
 0x2a2   : > { %v856_v30 = vsel %vm855_vm1, %v2248_v63, %v2250_v12 }
 0x2a3   : > { %857 = vst [vmem:[%s2255_s16] sm:$0x3] %v856_v30 }
 0x2a4   : > { %v861_v15 = vlaneseq }
 0x2a6   : > { %v2260_v6 = vshrl.u32 %v861_v15, 7  ;;  %v2263_v17 = vand.u32 127, %v861_v15 }
 0x2a8   : > { %v863_v14 = vadd.s32 8, %v2260_v6  ;;  %v864_v26 = vadd.s32 16, %v2260_v6  ;;  %v865_v27 = vadd.s32 24, %v2260_v6  ;;  %vm880_vm2 = vcmp.eq.s32.totalorder %v2260_v6, %v2263_v17 }
 0x2a9   : > { %v866_v19 = vadd.s32 32, %v2260_v6  ;;  %v896_v34 = vsel %vm880_vm2, %v2129_v43, 0.0  ;;  %v867_v36 = vadd.s32 40, %v2260_v6  ;;  %v868_v61 = vadd.s32 48, %v2260_v6 }
 0x2aa   : > { %vm881_vm3 = vcmp.eq.s32.totalorder %v863_v14, %v2263_v17  ;;  %vm882_vm4 = vcmp.eq.s32.totalorder %v864_v26, %v2263_v17  ;;  %vm883_vm5 = vcmp.eq.s32.totalorder %v865_v27, %v2263_v17  ;;  %v869_v13 = vadd.s32 56, %v2260_v6 }
 0x2ab   : > { %v897_v32 = vsel %vm881_vm3, %v2116_v46, 0.0  ;;  %v898_v31 = vsel %vm882_vm4, %v2131_v3, 0.0  ;;  %vm884_vm6 = vcmp.eq.s32.totalorder %v866_v19, %v2263_v17  ;;  %v899_v43 = vsel %vm883_vm5, %v2143_v16, 0.0 }
 0x2ac   : > { %v912_v47 = vadd.f32 %v897_v32, %v896_v34  ;;  %vm885_vm7 = vcmp.eq.s32.totalorder %v867_v36, %v2263_v17  ;;  %v933_v21 = vsel %vm880_vm2, %v1826_v20, 0.0  ;;  %v934_v3 = vsel %vm881_vm3, %v1830_v23, 0.0 }
 0x2ad   : > { %v900_v4 = vsel %vm884_vm6, %v2151_v8, 0.0  ;;  %v870_v45 = vadd.s32 64, %v2260_v6  ;;  %vm886_vm8 = vcmp.eq.s32.totalorder %v868_v61, %v2263_v17  ;;  %v935_v50 = vsel %vm882_vm4, %v1863_v44, 0.0 }
 0x2ae   : > { %v913_v46 = vadd.f32 %v912_v47, %v898_v31  ;;  %v901_v20 = vsel %vm885_vm7, %v2163_v54, 0.0  ;;  %v949_v25 = vadd.f32 %v934_v3, %v933_v21  ;;  %v871_v23 = vadd.s32 72, %v2260_v6 }
 0x2af   : > { %vm887_vm9 = vcmp.eq.s32.totalorder %v869_v13, %v2263_v17  ;;  %v936_v8 = vsel %vm883_vm5, %v1875_v53, 0.0  ;;  %v902_v38 = vsel %vm886_vm8, %v2176_v18, 0.0  ;;  %v872_v44 = vadd.s32 80, %v2260_v6 }
 0x2b0   : > { %v914_v16 = vadd.f32 %v913_v46, %v899_v43  ;;  %v950_v28 = vadd.f32 %v949_v25, %v935_v50  ;;  %vm888_vm10 = vcmp.eq.s32.totalorder %v870_v45, %v2263_v17  ;;  %v937_v56 = vsel %vm884_vm6, %v1897_v11, 0.0 }
 0x2b1   : > { %v903_v33 = vsel %vm887_vm9, %v2193_v39, 0.0  ;;  %v873_v53 = vadd.s32 88, %v2260_v6  ;;  %vm889_vm11 = vcmp.eq.s32.totalorder %v871_v23, %v2263_v17  ;;  %v938_v62 = vsel %vm885_vm7, %v1928_v57, 0.0 }
 0x2b2   : > { %v915_v48 = vadd.f32 %v914_v16, %v900_v4  ;;  %v951_v41 = vadd.f32 %v950_v28, %v936_v8  ;;  %v904_v49 = vsel %vm888_vm10, %v2202_v10, 0.0  ;;  %v874_v11 = vadd.s32 96, %v2260_v6 }
 0x2b3   : > { %vm890_vm12 = vcmp.eq.s32.totalorder %v872_v44, %v2263_v17  ;;  %v939_v35 = vsel %vm886_vm8, %v1951_v51, 0.0  ;;  %v905_v30 = vsel %vm889_vm11, %v2211_v7, 0.0  ;;  %v875_v57 = vadd.s32 104, %v2260_v6 }
 0x2b4   : > { %v916_v54 = vadd.f32 %v915_v48, %v901_v20  ;;  %v952_v5 = vadd.f32 %v951_v41, %v937_v56  ;;  %vm891_vm13 = vcmp.eq.s32.totalorder %v873_v53, %v2263_v17  ;;  %v940_v14 = vsel %vm887_vm9, %v1982_v0, 0.0 }
 0x2b5   : > { %v906_v26 = vsel %vm890_vm12, %v2221_v58, 0.0  ;;  %v876_v51 = vadd.s32 112, %v2260_v6  ;;  %vm892_vm14 = vcmp.eq.s32.totalorder %v874_v11, %v2263_v17  ;;  %v941_v19 = vsel %vm888_vm10, %v2019_v42, 0.0 }
 0x2b6   : > { %v917_v18 = vadd.f32 %v916_v54, %v902_v38  ;;  %v953_v15 = vadd.f32 %v952_v5, %v938_v62  ;;  %v907_v34 = vsel %vm891_vm13, %v2224_v29, 0.0  ;;  %v877_v0 = vadd.s32 120, %v2260_v6 }
 0x2b7   : > { %vm893_vm15 = vcmp.eq.s32.totalorder %v875_v57, %v2263_v17  ;;  %v942_v36 = vsel %vm889_vm11, %v2033_v60, 0.0  ;;  %v908_v31 = vsel %vm892_vm14, %v2229_v22, 0.0  ;;  %vm894_vm0 = vcmp.eq.s32.totalorder %v876_v51, %v2263_v17 }
 0x2b8   : > { %v918_v39 = vadd.f32 %v917_v18, %v903_v33  ;;  %v954_v27 = vadd.f32 %v953_v15, %v939_v35  ;;  %v943_v29 = vsel %vm890_vm12, %v2058_v24, 0.0  ;;  %v909_v6 = vsel %vm893_vm15, %v2234_v9, 0.0 }
 0x2b9   : > { %vm895_vm2 = vcmp.eq.s32.totalorder %v877_v0, %v2263_v17  ;;  %v944_v22 = vsel %vm891_vm13, %v2093_v1, 0.0  ;;  %v910_v13 = vsel %vm894_vm0, %v2238_v52, 0.0  ;;  %v945_v24 = vsel %vm892_vm14, %v2110_v37, 0.0 }
 0x2ba   : > { %v919_v10 = vadd.f32 %v918_v39, %v904_v49  ;;  %v955_v32 = vadd.f32 %v954_v27, %v940_v14  ;;  %v911_v9 = vsel %vm895_vm2, %v2242_v2, 0.0  ;;  %v946_v1 = vsel %vm893_vm15, %v2173_v55, 0.0 }
 0x2bb   : > { %v947_v52 = vsel %vm894_vm0, %v2190_v59, 0.0  ;;  %v948_v37 = vsel %vm895_vm2, %v2217_v40, 0.0 }
 0x2bc   : > { %v920_v7 = vadd.f32 %v919_v10, %v905_v30  ;;  %v956_v61 = vadd.f32 %v955_v32, %v941_v19 }
 0x2be   : > { %v921_v58 = vadd.f32 %v920_v7, %v906_v26  ;;  %v957_v47 = vadd.f32 %v956_v61, %v942_v36 }
 0x2c0   : > { %v922_v42 = vadd.f32 %v921_v58, %v907_v34  ;;  %v958_v43 = vadd.f32 %v957_v47, %v943_v29 }
 0x2c2   : > { %v923_v60 = vadd.f32 %v922_v42, %v908_v31  ;;  %v959_v21 = vadd.f32 %v958_v43, %v944_v22 }
 0x2c4   : > { %v924_v46 = vadd.f32 %v923_v60, %v909_v6  ;;  %v960_v4 = vadd.f32 %v959_v21, %v945_v24 }
 0x2c6   : > { %v925_v3 = vadd.f32 %v924_v46, %v910_v13  ;;  %v961_v16 = vadd.f32 %v960_v4, %v946_v1 }
 0x2c8   : > { %v926_v45 = vadd.f32 %v925_v3, %v911_v9  ;;  %v962_v20 = vadd.f32 %v961_v16, %v947_v52 }
 0x2ca   : > { %v927_v50 = vrot.slane %v926_v45, 4  ;;  %v963_v25 = vadd.f32 %v962_v20, %v948_v37 }
 0x2cc   : > { %v928_v2 = vadd.f32 %v927_v50, %v926_v45  ;;  %v964_v48 = vrot.slane %v963_v25, 4 }
 0x2ce   : > { %v929_v23 = vrot.slane %v928_v2, 2  ;;  %v965_v55 = vadd.f32 %v964_v48, %v963_v25 }
 0x2d0   : > { %v930_v8 = vadd.f32 %v929_v23, %v928_v2  ;;  %v966_v28 = vrot.slane %v965_v55, 2 }
 0x2d2   : > { %v931_v38 = vrot.slane %v930_v8, 1  ;;  %v967_v54 = vadd.f32 %v966_v28, %v965_v55 }
 0x2d4   : > { %v932_v44 = vadd.f32 %v931_v38, %v930_v8  ;;  %v968_v56 = vrot.slane %v967_v54, 1 }
 0x2d6   : > { %v969_v59 = vadd.f32 %v968_v56, %v967_v54  ;;  %v970_v33 = vsub.f32 %v2248_v63, %v932_v44 }
 0x2d8   : > { %v971_v41 = vsub.f32 %v2250_v12, %v969_v59 }
 0x2da   : > { %v972_v40 = vsel %vm855_vm1, %v970_v33, %v971_v41 }
 0x2db   : > { %973 = vst [vmem:[%s2255_s16] sm:$0x3] %v972_v40 }
 0x2dc PF: > { %s1128_s20 = sshll.u32 %s1570_s5, 1  ;;  %s987_s21 = sshll.u32 %s2255_s16, 4  ;;  %s988_s21 = int_to_ptr.vmem [resolvable:$true] %s987_s21 }
 0x2dd   : > { %s985_s11 = scalar_lea.hbm %s2453_s4, %s1128_s20  ;;  %s975_s27 = scalar_lea.sflag [#allocation7], %s222_s15 }
 0x2de   : > { %s989_s9 = sshll.u32 %s985_s11, 4  ;;  %s1382_s5 = scalar_lea.hbm %s2453_s4, 6  ;;  %s990_s9 = int_to_ptr.hbm [resolvable:$true] %s989_s9 }
 0x2df   : > { %s1376_s8 = sshra.s32 %s990_s9, 4  ;;  %s1377_s8 = int_to_ptr.hbm [resolvable:$true] %s1376_s8 }
 0x2e0   : > { %s1378_s10 = scalar_lea.hbm %s1377_s8, 2  ;;  %p1383_p3 = scmp.lt.s32.totalorder %s1377_s8, %s2453_s4 }
 0x2e1   : > { %p1379_p8 = scmp.ne.s32.totalorder %s1377_s8, %s1378_s10  ;;  %p1384_p13 = scmp.lt.s32.totalorder %s1382_s5, %s1378_s10 }
 0x2e3   : > { %p1380_p10 = pnand %p1379_p8, %p1610_p11  ;;  %p1385_p4 = por %p1384_p13, %p1383_p3 }
 0x2e5   : > { %p1381_p1 = pneg %p1380_p10 }
 0x2e7   : > { %p1386_p9 = pnand %p1385_p4, %p1381_p1 }
 0x2e9   : > { %1389 = shalt.err (!%p1386_p9)
}
 0x2ea   : > { %1141 = dma.vmem_to_hbm [thread:$0]  (%p1610_p11), %s988_s21, 32, %s990_s9, %s975_s27  }
 0x2eb PF: > { %p1159_p12 = scmp.ge.s32.totalorder %s1482_s30, 2  ;;  %s1001_s19 = sand.u32 1, %s1446_s0  }
 0x2ec   : > { %s1002_s13 = scalar_lea.sflag [#allocation7], %s1001_s19 }
 0x2ed   : > { %p1155_p6 = pnand %p1159_p12, %p1615_p0 }
 0x2ef   : > { %p1156_p2 = pneg %p1155_p6 }
 0x2f1   : > { %1441 = dma.done.wait (%p1156_p2), %s1002_s13, 32  }
 0x2f2   : > { %1443 = vsyncadd (%p1156_p2), %s1002_s13, 4294967264  ;;  %s2490_s15 = sld [smem:[#allocation19_spill]]  ;;  %p33_p11 = scmp.ge.s32.totalorder %s1574_s7, 5  }
 0x2f3   : > { %s2491_s1 = sld [smem:[#allocation21_spill]]  ;;  %s2494_s0 = smov %s1450_s23 }
 0x2f4   : > { %s2492_s18 = sld [smem:[#allocation20_spill]]  ;;  %s2496_s24 = smov %s1462_s25 }
 0x2f5   : > { %s2493_s29 = sld [smem:[#allocation22_spill]]  ;;  %s2497_s25 = smov %s1466_s26 }
 0x2f6   : > { %s2498_s26 = smov %s1681_s14  ;;  %s2499_s27 = smov %s1474_s28 }
 0x2f7   : > { %s2501_s30 = smov %s1574_s7  ;;  %35 = sbr.rel (!%p33_p11) target bundleno = 18 (0x12), region = 90 }
 0x2f8   : > { %s2495_s23 = smov %s2490_s15 }
 0x2fa   : > { %s2500_s28 = smov %s2492_s18 }
 0x2fc   :  { %1008 = vsyncpa [#allocation6], 1 }
 0x2fd   :  { %1010 = vsyncpa [#allocation6 + $0x1], 1 }
 0x2fe   :  { %1011 = vsyncpa [#allocation9], 1 }
 0x2ff   :  { %1013 = vsyncpa [#allocation9 + $0x1], 1 }
 0x300   :  { %1014 = vsyncpa [#allocation7], 1 }
 0x301   :  { %1016 = vsyncpa [#allocation7 + $0x1], 1 }

</bundles_post_ra>
